<compile_context>
chip_gen: v7x
topology: tpu7x:2x2x1
jax: 0.10.0
libtpu: 0.0.40
codegen_flags: <defaults>
</compile_context>

<pallas_src>
import functools

import jax
import jax.numpy as jnp
from jax import lax
from jax.experimental import pallas as pl
from jax.experimental.pallas import tpu as pltpu


def _round_up(x, m):
    return ((x + m - 1) // m) * m


def _tcn_kernel(x_hbm, w_ref, b_ref, o_ref, xbuf, sem, act_ref, *,
                dilations, kernel_size, halo, tile, window, c_pad):
    """All TemporalBlock levels fused; one (batch, L-tile) grid point.

    x_hbm  : (B, C_pad, halo + L_pad)  halo-padded input, left in HBM (ANY)
    w_ref  : (2*levels, C_pad, K*C_pad) im2col conv weights, bf16, tap-major
    b_ref  : (2*levels, C_pad, 1)       conv biases, f32
    o_ref  : (1, C_pad, T)              output tile (last T window columns)
    xbuf   : (2, C_pad, W)              double-buffered input window (scratch)
    sem    : DMA semaphores (2,)
    act_ref: (C_pad, W) f32             inter-level activation staging
    """
    b = pl.program_id(0)
    j = pl.program_id(1)
    num_tiles = pl.num_programs(1)
    T, W, K = tile, window, kernel_size
    slot = j % 2

    def window_copy(tile_idx, s):
        start = pl.multiple_of(tile_idx * T, 128)
        return pltpu.make_async_copy(
            x_hbm.at[b, :, pl.ds(start, W)], xbuf.at[s], sem.at[s])

    # Prime the double buffer at the start of every batch's tile chain (the
    # time axis is sequential per batch; batch may be megacore-split).
    @pl.when(j == 0)
    def _():
        window_copy(j, slot).start()

    window_copy(j, slot).wait()

    # Prefetch the next tile's window while this tile is being computed.
    @pl.when(j + 1 < num_tiles)
    def _():
        window_copy(j + 1, 1 - slot).start()

    # Stage the window as the level-0 activation (f32 for relu/residual).
    act_ref[...] = xbuf[slot].astype(jnp.float32)

    # Hoisted once: lane-position iota row shared by every causal mask.
    t_row = lax.broadcasted_iota(jnp.int32, (1, W), 1)
    # Window column w corresponds to original time position (j*T - halo + w).
    base = j * T - halo

    use_split_dots = c_pad >= 128          # contraction already at MXU depth

    for level, dilation in enumerate(dilations):
        x = act_ref[...]                   # (C_pad, W) f32
        h = x
        for conv_idx in range(2):
            wi = 2 * level + conv_idx
            # The very first conv reads literal zeros at t < 0 (left pad), so
            # its causal mask is a no-op and is skipped statically.
            need_mask = not (level == 0 and conv_idx == 0)
            h_b = h.astype(jnp.bfloat16)   # bf16 operands for the MXU
            taps = []
            for k in range(K):
                shift = (K - 1 - k) * dilation
                if shift == 0:
                    taps.append(h_b)
                    continue
                tap = jnp.roll(h_b, shift, axis=1)
                if need_mask:
                    # Zero contributions whose source time position is < 0
                    # (the causal zero padding each Conv1d applies).  For
                    # interior tiles the threshold is <= 0 and this keeps
                    # everything; wrapped garbage stays in the discard zone.
                    tap = jnp.where(t_row >= shift - base, tap, 0)
                taps.append(tap)
            if use_split_dots:
                # K accumulated dots: no (K*C_pad, W) concat temp.
                acc = jnp.dot(w_ref[wi, :, 0:c_pad], taps[0],
                              preferred_element_type=jnp.float32)
                for k in range(1, K):
                    acc += jnp.dot(w_ref[wi, :, k * c_pad:(k + 1) * c_pad],
                                   taps[k], preferred_element_type=jnp.float32)
                h = acc + b_ref[wi]
            else:
                stacked = jnp.concatenate(taps, axis=0)   # (K*C_pad, W) bf16
                h = jnp.dot(w_ref[wi], stacked,
                            preferred_element_type=jnp.float32) + b_ref[wi]
            h = jnp.maximum(h, 0.0)        # conv + chomp + relu
        act_ref[...] = jnp.maximum(h + x, 0.0)   # residual + relu (f32 exact)

    # halo is a multiple of 128, so this is an aligned, unmasked lane slice.
    o_ref[0] = act_ref[:, pl.ds(halo, T)].astype(o_ref.dtype)


def temporal_conv_net(x, params, kernel_size, *, tile_t=None):
    """Fused TCN forward.  x: (B, C, L) -> (B, C, L)."""
    B, c_in, L = x.shape
    num_levels = len(params)
    K = kernel_size

    # The PyTorch TemporalBlock here has no downsample conv, so the residual
    # add requires every level to keep the input channel width.
    for p in params:
        assert p["w1"].shape[1] == c_in and p["w1"].shape[2] == c_in, \
            "TemporalBlock residual requires constant channel width"
        assert p["w2"].shape[1] == c_in and p["w2"].shape[2] == c_in

    C = c_in
    if C >= 96:
        C_pad = _round_up(C, 128)          # production widths: MXU-dim padding
    else:
        C_pad = _round_up(max(C, 8), 8)    # tiny C: sublane-aligned only
    # TODO(synk): for genuinely tiny C (this test config) the MXU is ~99% idle;
    # a VPU broadcast-FMA tap loop would be faster still.

    dilations = tuple(int(p["dilation"]) for p in params)
    raw_halo = sum(2 * (K - 1) * d for d in dilations)   # total causal extent
    halo = _round_up(raw_halo, 128)        # lane-aligned; rounding UP is safe

    itemsize = jnp.dtype(x.dtype).itemsize

    def vmem_bytes(t):
        w = t + halo
        return int(
            2 * C_pad * w * itemsize                        # 2x input window
            + 2 * C_pad * t * itemsize                      # pipelined output
            + 2 * (2 * num_levels) * C_pad * (K * C_pad) * 2  # bf16 weights x2
            + 2 * (2 * num_levels) * C_pad * 4              # f32 biases x2
            + C_pad * w * 4                                 # activation scratch
            + (3 + K) * C_pad * w * 4)                      # live x/h/tap values

    try:
        vmem_cap = int(getattr(pltpu.get_tpu_info(), "vmem_capacity_bytes",
                               64 << 20))
    except Exception:
        vmem_cap = 64 << 20                # conservative default (v7x per-core)
    budget = (vmem_cap * 7) // 10

    if tile_t is not None:
        T = _round_up(tile_t, 128)
    else:
        # Prefer T >= 4*halo so redundant halo recompute stays <= ~25%, never
        # tile past the (padded) sequence, and stay inside the VMEM budget.
        T = max(512, 4 * halo) if halo else 512
        T = min(T, max(128, _round_up(L, 128)))
        while T > 128 and vmem_bytes(T) > budget:
            T -= 128
    L_pad = _round_up(L, T)
    num_tiles = L_pad // T
    W = T + halo
    vmem_limit = int(min(vmem_cap, max(32 << 20, 2 * vmem_bytes(T))))

    # The ONLY wrapper-side copy of the input: causal left pad (halo zeros),
    # right pad L to a tile multiple, channel pad to the sublane/MXU multiple.
    # Overlapping windows are read straight out of this array by kernel DMAs.
    xp = jnp.pad(x, ((0, 0), (0, C_pad - C), (halo, L_pad - L)))

    # Stack all levels' conv weights in im2col form (tap-major columns), bf16.
    ws, bs = [], []
    for p in params:
        for w, bvec in ((p["w1"], p["b1"]), (p["w2"], p["b2"])):
            w_eff = jnp.zeros((C_pad, K * C_pad), jnp.float32)
            for k in range(K):
                w_eff = w_eff.at[:w.shape[1],
                                 k * C_pad:k * C_pad + w.shape[2]].set(
                    w[k].astype(jnp.float32))
            ws.append(w_eff)
            bs.append(jnp.zeros((C_pad, 1), jnp.float32)
                      .at[:bvec.shape[0]].set(bvec.astype(jnp.float32)))
    w_all = jnp.stack(ws).astype(jnp.bfloat16)   # (2*levels, C_pad, K*C_pad)
    b_all = jnp.stack(bs)                        # (2*levels, C_pad, 1) f32

    kern = functools.partial(_tcn_kernel, dilations=dilations, kernel_size=K,
                             halo=halo, tile=T, window=W, c_pad=C_pad)

    flops = 2 * B * num_tiles * (2 * num_levels) * C_pad * (K * C_pad) * W
    bytes_accessed = (B * num_tiles * C_pad * W * itemsize
                      + B * C_pad * L_pad * itemsize
                      + int(w_all.size) * 2 + int(b_all.size) * 4)

    out_padded = pl.pallas_call(
        kern,
        out_shape=jax.ShapeDtypeStruct((B, C_pad, L_pad), x.dtype),
        grid=(B, num_tiles),
        in_specs=[
            # Halo-padded input stays in HBM; overlapping windows are DMA'd
            # manually inside the kernel (double-buffered).
            pl.BlockSpec(memory_space=pl.ANY),
            # Weights/biases: constant block index -> VMEM resident.
            # TODO(synk): single-buffer these (pipeline_mode=pl.Buffered(1)) to
            # halve weight VMEM on v7x once verified on the deployed JAX.
            pl.BlockSpec((2 * num_levels, C_pad, K * C_pad),
                         lambda b, j: (0, 0, 0)),
            pl.BlockSpec((2 * num_levels, C_pad, 1), lambda b, j: (0, 0, 0)),
        ],
        out_specs=pl.BlockSpec((1, C_pad, T), lambda b, j: (b, 0, j)),
        scratch_shapes=[
            pltpu.VMEM((2, C_pad, W), x.dtype),      # double-buffered window
            pltpu.SemaphoreType.DMA((2,)),
            pltpu.VMEM((C_pad, W), jnp.float32),     # inter-level activation
        ],
        compiler_params=pltpu.CompilerParams(
            dimension_semantics=("parallel", "arbitrary"),
            vmem_limit_bytes=vmem_limit),
        cost_estimate=pl.CostEstimate(flops=int(flops), transcendentals=0,
                                      bytes_accessed=int(bytes_accessed)),
    )(xp, w_all, b_all)

    # TODO(synk): for very deep stacks (halo ~ T), replace the halo recompute
    # with a per-level left-context carry held in VMEM scratch across the
    # (already sequential) time axis.
    return out_padded[:, :C, :L]


def init_tcn_params(key, num_inputs, num_channels, kernel_size):
    """Deterministic parameter init matching the module's shapes."""
    params = []
    in_ch = num_inputs
    for i, out_ch in enumerate(num_channels):
        key, k1, k2, k3, k4 = jax.random.split(key, 5)
        # effective conv weights ~ N(0, 0.01), stored tap-major (K, Cout, Cin)
        w1 = 0.01 * jax.random.normal(k1, (kernel_size, out_ch, in_ch), jnp.float32)
        b1 = 0.05 * jax.random.normal(k2, (out_ch, 1), jnp.float32)
        w2 = 0.01 * jax.random.normal(k3, (kernel_size, out_ch, out_ch), jnp.float32)
        b2 = 0.05 * jax.random.normal(k4, (out_ch, 1), jnp.float32)
        params.append(dict(w1=w1, b1=b1, w2=w2, b2=b2, dilation=2 ** i))
        in_ch = out_ch
    return params


# ------------------------- pure-JAX reference ------------------------------
def _ref_causal_conv(x, w_taps, b, dilation, kernel_size):
    # reproduce PyTorch Conv1d(padding=(K-1)*d) followed by Chomp1d
    w = jnp.transpose(w_taps, (1, 2, 0))          # (Cout, Cin, K)
    pad = (kernel_size - 1) * dilation
    out = lax.conv_general_dilated(
        x, w, window_strides=(1,), padding=[(pad, pad)],
        rhs_dilation=(dilation,), dimension_numbers=("NCH", "OIH", "NCH"))
    out = out[:, :, : x.shape[2]]                 # chomp trailing pad
    return out + b[None, :, :]


def temporal_conv_net_ref(x, params, kernel_size):
    out = x
    for p in params:
        h = jax.nn.relu(_ref_causal_conv(out, p["w1"], p["b1"],
                                         p["dilation"], kernel_size))
        h = jax.nn.relu(_ref_causal_conv(h, p["w2"], p["b2"],
                                         p["dilation"], kernel_size))
        out = jax.nn.relu(h + out)
    return out


if __name__ == "__main__":
    # Module config: residual add in TemporalBlock has no downsample, so
    # channel counts must stay constant across levels.
    batch = 2
    num_inputs = 4
    seq_len = 200
    num_channels = [4, 4, 4]      # 3 levels, dilations 1, 2, 4
    kernel_size = 2

    key = jax.random.PRNGKey(0)
    key, kx = jax.random.split(key)
    x = jax.random.normal(kx, (batch, num_inputs, seq_len), jnp.float32)

    params = init_tcn_params(key, num_inputs, num_channels, kernel_size)

    # tile_t=128 exercises the multi-tile path (DMA prime + prefetch, causal
    # masking on tile 0, mask-free interior tile 1) even at small L.
    out = temporal_conv_net(x, params, kernel_size, tile_t=128)
    out = jax.block_until_ready(out)

    ref = temporal_conv_net_ref(x, params, kernel_size)
    assert out.shape == (batch, num_channels[-1], seq_len)
    assert out.dtype == x.dtype
    # bf16 matmuls (f32 accumulation, f32 residual path) -> loosened tolerance.
    assert jnp.allclose(out, ref, atol=1e-2, rtol=1e-2), "mismatch vs reference"

    print("KERNEL_OK")
</pallas_src>

<mosaic_0001>
module attributes {stable_mosaic.version = 11 : i64} {
  func.func @_tcn_kernel(%arg0: i32, %arg1: i32, %arg2: memref<2x8x384xf32, #tpu.memory_space<any>>, %arg3: memref<6x8x16xbf16, #tpu.memory_space<vmem>>, %arg4: memref<6x8x1xf32, #tpu.memory_space<vmem>>, %arg5: memref<1x8x128xf32, #tpu.memory_space<vmem>>, %arg6: memref<2x8x256xf32, #tpu.memory_space<vmem>>, %arg7: memref<2x!tpu.dma_semaphore, #tpu.memory_space<semaphore_mem>>, %arg8: memref<8x256xf32, #tpu.memory_space<vmem>>) attributes {dimension_semantics = [#tpu.dimension_semantics<parallel>, #tpu.dimension_semantics<arbitrary>], iteration_bounds = array<i64: 2, 2>, scalar_prefetch = 0 : i64, scratch_operands = 3 : i64, tpu.core_type = #tpu.core_type<tc>, window_params = [{}, {pipeline_mode = #tpu.pipeline_mode<synchronous>, transform_indices = @transform_1, window_bounds = array<i64: 6, 8, 16>}, {pipeline_mode = #tpu.pipeline_mode<synchronous>, transform_indices = @transform_2, window_bounds = array<i64: 6, 8, 1>}, {transform_indices = @transform_3, window_bounds = array<i64: 1, 8, 128>}]} {
    %c2_i32 = arith.constant 2 : i32
    %c0_i32 = arith.constant 0 : i32
    %0 = arith.cmpi eq, %c2_i32, %c0_i32 : i32
    %c1_i32 = arith.constant 1 : i32
    %1 = arith.select %0, %c1_i32, %c2_i32 : i32
    %2 = arith.remsi %arg1, %1 : i32
    %c0_i32_0 = arith.constant 0 : i32
    %3 = arith.cmpi ne, %2, %c0_i32_0 : i32
    %c0_i32_1 = arith.constant 0 : i32
    %4 = arith.cmpi slt, %2, %c0_i32_1 : i32
    %c0_i32_2 = arith.constant 0 : i32
    %5 = arith.cmpi slt, %1, %c0_i32_2 : i32
    %6 = arith.xori %4, %5 : i1
    %7 = arith.andi %6, %3 : i1
    %8 = arith.addi %2, %1 : i32
    %9 = arith.select %7, %8, %2 : i32
    %c0_i32_3 = arith.constant 0 : i32
    %10 = arith.cmpi eq, %arg1, %c0_i32_3 : i32
    %11 = arith.extui %10 : i1 to i32
    %c0_i32_4 = arith.constant 0 : i32
    %12 = arith.cmpi ne, %11, %c0_i32_4 : i32
    scf.if %12 {
      %c128_i32_86 = arith.constant 128 : i32
      %175 = arith.muli %arg1, %c128_i32_86 : i32
      %176 = tpu.assume_multiple %175, 128 : i32
      %c0_i32_87 = arith.constant 0 : i32
      %177 = tpu.memref_slice %arg2[%arg0, %c0_i32_87, %176] : memref<2x8x384xf32, #tpu.memory_space<any>> -> memref<1x8x256xf32, #tpu.memory_space<any>>
      %178 = tpu.memref_squeeze %177 : memref<1x8x256xf32, #tpu.memory_space<any>> -> memref<8x256xf32, #tpu.memory_space<any>>
      %c0_i32_88 = arith.constant 0 : i32
      %c0_i32_89 = arith.constant 0 : i32
      %179 = tpu.memref_slice %arg6[%9, %c0_i32_88, %c0_i32_89] : memref<2x8x256xf32, #tpu.memory_space<vmem>> -> memref<1x8x256xf32, #tpu.memory_space<vmem>>
      %180 = tpu.memref_squeeze %179 : memref<1x8x256xf32, #tpu.memory_space<vmem>> -> memref<8x256xf32, #tpu.memory_space<vmem>>
      %181 = tpu.memref_slice %arg7[%9] : memref<2x!tpu.dma_semaphore, #tpu.memory_space<semaphore_mem>> -> memref<1x!tpu.dma_semaphore, #tpu.memory_space<semaphore_mem>>
      %182 = tpu.memref_squeeze %181 : memref<1x!tpu.dma_semaphore, #tpu.memory_space<semaphore_mem>> -> memref<!tpu.dma_semaphore, #tpu.memory_space<semaphore_mem>>
      tpu.enqueue_dma source(%178 : memref<8x256xf32, #tpu.memory_space<any>>) target(%180 : memref<8x256xf32, #tpu.memory_space<vmem>>) target_semaphore(%182 : memref<!tpu.dma_semaphore, #tpu.memory_space<semaphore_mem>>)
    } else {
    }
    %c128_i32 = arith.constant 128 : i32
    %13 = arith.muli %arg1, %c128_i32 : i32
    %14 = tpu.assume_multiple %13, 128 : i32
    %c0_i32_5 = arith.constant 0 : i32
    %15 = tpu.memref_slice %arg2[%arg0, %c0_i32_5, %14] : memref<2x8x384xf32, #tpu.memory_space<any>> -> memref<1x8x256xf32, #tpu.memory_space<any>>
    %16 = tpu.memref_squeeze %15 : memref<1x8x256xf32, #tpu.memory_space<any>> -> memref<8x256xf32, #tpu.memory_space<any>>
    %c0_i32_6 = arith.constant 0 : i32
    %c0_i32_7 = arith.constant 0 : i32
    %17 = tpu.memref_slice %arg6[%9, %c0_i32_6, %c0_i32_7] : memref<2x8x256xf32, #tpu.memory_space<vmem>> -> memref<1x8x256xf32, #tpu.memory_space<vmem>>
    %18 = tpu.memref_squeeze %17 : memref<1x8x256xf32, #tpu.memory_space<vmem>> -> memref<8x256xf32, #tpu.memory_space<vmem>>
    %19 = tpu.memref_slice %arg7[%9] : memref<2x!tpu.dma_semaphore, #tpu.memory_space<semaphore_mem>> -> memref<1x!tpu.dma_semaphore, #tpu.memory_space<semaphore_mem>>
    %20 = tpu.memref_squeeze %19 : memref<1x!tpu.dma_semaphore, #tpu.memory_space<semaphore_mem>> -> memref<!tpu.dma_semaphore, #tpu.memory_space<semaphore_mem>>
    tpu.wait_dma2 semaphore(%20 : memref<!tpu.dma_semaphore, #tpu.memory_space<semaphore_mem>>) src(%16 : memref<8x256xf32, #tpu.memory_space<any>>) dst(%18 : memref<8x256xf32, #tpu.memory_space<vmem>>)
    %c1_i32_8 = arith.constant 1 : i32
    %21 = arith.addi %arg1, %c1_i32_8 : i32
    %c2_i32_9 = arith.constant 2 : i32
    %22 = arith.cmpi slt, %21, %c2_i32_9 : i32
    %23 = arith.extui %22 : i1 to i32
    %c0_i32_10 = arith.constant 0 : i32
    %24 = arith.cmpi ne, %23, %c0_i32_10 : i32
    scf.if %24 {
      %c1_i32_86 = arith.constant 1 : i32
      %175 = arith.addi %arg1, %c1_i32_86 : i32
      %c1_i32_87 = arith.constant 1 : i32
      %176 = arith.subi %c1_i32_87, %9 : i32
      %c128_i32_88 = arith.constant 128 : i32
      %177 = arith.muli %175, %c128_i32_88 : i32
      %178 = tpu.assume_multiple %177, 128 : i32
      %c0_i32_89 = arith.constant 0 : i32
      %179 = tpu.memref_slice %arg2[%arg0, %c0_i32_89, %178] : memref<2x8x384xf32, #tpu.memory_space<any>> -> memref<1x8x256xf32, #tpu.memory_space<any>>
      %180 = tpu.memref_squeeze %179 : memref<1x8x256xf32, #tpu.memory_space<any>> -> memref<8x256xf32, #tpu.memory_space<any>>
      %c0_i32_90 = arith.constant 0 : i32
      %c0_i32_91 = arith.constant 0 : i32
      %181 = tpu.memref_slice %arg6[%176, %c0_i32_90, %c0_i32_91] : memref<2x8x256xf32, #tpu.memory_space<vmem>> -> memref<1x8x256xf32, #tpu.memory_space<vmem>>
      %182 = tpu.memref_squeeze %181 : memref<1x8x256xf32, #tpu.memory_space<vmem>> -> memref<8x256xf32, #tpu.memory_space<vmem>>
      %183 = tpu.memref_slice %arg7[%176] : memref<2x!tpu.dma_semaphore, #tpu.memory_space<semaphore_mem>> -> memref<1x!tpu.dma_semaphore, #tpu.memory_space<semaphore_mem>>
      %184 = tpu.memref_squeeze %183 : memref<1x!tpu.dma_semaphore, #tpu.memory_space<semaphore_mem>> -> memref<!tpu.dma_semaphore, #tpu.memory_space<semaphore_mem>>
      tpu.enqueue_dma source(%180 : memref<8x256xf32, #tpu.memory_space<any>>) target(%182 : memref<8x256xf32, #tpu.memory_space<vmem>>) target_semaphore(%184 : memref<!tpu.dma_semaphore, #tpu.memory_space<semaphore_mem>>)
    } else {
    }
    %25 = arith.index_cast %9 : i32 to index
    %c0 = arith.constant 0 : index
    %c0_11 = arith.constant 0 : index
    %26 = vector.load %arg6[%25, %c0, %c0_11] : memref<2x8x256xf32, #tpu.memory_space<vmem>>, vector<1x8x256xf32>
    %27 = vector.shape_cast %26 : vector<1x8x256xf32> to vector<8x256xf32>
    %c0_12 = arith.constant 0 : index
    %c0_13 = arith.constant 0 : index
    %28 = vector.load %arg8[%c0_12, %c0_13] : memref<8x256xf32, #tpu.memory_space<vmem>>, vector<8x256xf32>
    tpu.vector_store %arg8[%c0_12, %c0_13], %27 {strides = array<i32>} : memref<8x256xf32, #tpu.memory_space<vmem>>, vector<8x256xf32>,
    %29 = tpu.iota {dimensions = array<i32: 1>} : vector<1x256xi32>
    %c128_i32_14 = arith.constant 128 : i32
    %30 = arith.muli %arg1, %c128_i32_14 : i32
    %c128_i32_15 = arith.constant 128 : i32
    %31 = arith.subi %30, %c128_i32_15 : i32
    %c0_16 = arith.constant 0 : index
    %c0_17 = arith.constant 0 : index
    %32 = vector.load %arg8[%c0_16, %c0_17] : memref<8x256xf32, #tpu.memory_space<vmem>>, vector<8x256xf32>
    %33 = arith.truncf %32 : vector<8x256xf32> to vector<8x256xbf16>
    %34 = vector.extract_strided_slice %33 {offsets = [0, 255], sizes = [8, 1], strides = [1, 1]} : vector<8x256xbf16> to vector<8x1xbf16>
    %35 = vector.extract_strided_slice %33 {offsets = [0, 0], sizes = [8, 255], strides = [1, 1]} : vector<8x256xbf16> to vector<8x255xbf16>
    %36 = tpu.concatenate %34, %35 in 1 : vector<8x1xbf16>, vector<8x255xbf16> -> vector<8x256xbf16>
    %37 = tpu.concatenate %36, %33 in 0 : vector<8x256xbf16>, vector<8x256xbf16> -> vector<16x256xbf16>
    %c0_18 = arith.constant 0 : index
    %c0_19 = arith.constant 0 : index
    %c0_20 = arith.constant 0 : index
    %38 = vector.load %arg3[%c0_18, %c0_19, %c0_20] : memref<6x8x16xbf16, #tpu.memory_space<vmem>>, vector<1x8x16xbf16>
    %39 = vector.shape_cast %38 : vector<1x8x16xbf16> to vector<8x16xbf16>
    %cst = arith.constant dense<0.000000e+00> : vector<8x256xf32>
    %40 = tpu.matmul %39, %37, %cst {dimension_numbers = #tpu.dot_dimension_numbers<[1], [0], [0], [1], [0, 0, 1, 1], [], []>} : vector<8x16xbf16>, vector<16x256xbf16>, vector<8x256xf32> -> vector<8x256xf32>
    %c0_21 = arith.constant 0 : index
    %c0_22 = arith.constant 0 : index
    %c0_23 = arith.constant 0 : index
    %41 = vector.load %arg4[%c0_21, %c0_22, %c0_23] : memref<6x8x1xf32, #tpu.memory_space<vmem>>, vector<1x8x1xf32>
    %42 = vector.shape_cast %41 : vector<1x8x1xf32> to vector<8x1xf32>
    %43 = vector.broadcast %42 : vector<8x1xf32> to vector<8x256xf32>
    %44 = arith.addf %40, %43 : vector<8x256xf32>
    %cst_24 = arith.constant 0.000000e+00 : f32
    %45 = vector.broadcast %cst_24 : f32 to vector<8x256xf32>
    %46 = arith.maximumf %44, %45 : vector<8x256xf32>
    %47 = arith.truncf %46 : vector<8x256xf32> to vector<8x256xbf16>
    %48 = vector.extract_strided_slice %47 {offsets = [0, 255], sizes = [8, 1], strides = [1, 1]} : vector<8x256xbf16> to vector<8x1xbf16>
    %49 = vector.extract_strided_slice %47 {offsets = [0, 0], sizes = [8, 255], strides = [1, 1]} : vector<8x256xbf16> to vector<8x255xbf16>
    %50 = tpu.concatenate %48, %49 in 1 : vector<8x1xbf16>, vector<8x255xbf16> -> vector<8x256xbf16>
    %c1_i32_25 = arith.constant 1 : i32
    %51 = arith.subi %c1_i32_25, %31 : i32
    %52 = vector.broadcast %51 : i32 to vector<1x256xi32>
    %53 = arith.cmpi sge, %29, %52 : vector<1x256xi32>
    %c0_i32_26 = arith.constant 0 : i32
    %54 = arith.sitofp %c0_i32_26 : i32 to bf16
    %55 = vector.shape_cast %53 : vector<1x256xi1> to vector<1x256xi1>
    %56 = vector.broadcast %55 : vector<1x256xi1> to vector<8x256xi1>
    %57 = vector.broadcast %54 : bf16 to vector<8x256xbf16>
    %58 = arith.select %56, %50, %57 : vector<8x256xi1>, vector<8x256xbf16>
    %59 = tpu.concatenate %58, %47 in 0 : vector<8x256xbf16>, vector<8x256xbf16> -> vector<16x256xbf16>
    %c1 = arith.constant 1 : index
    %c0_27 = arith.constant 0 : index
    %c0_28 = arith.constant 0 : index
    %60 = vector.load %arg3[%c1, %c0_27, %c0_28] : memref<6x8x16xbf16, #tpu.memory_space<vmem>>, vector<1x8x16xbf16>
    %61 = vector.shape_cast %60 : vector<1x8x16xbf16> to vector<8x16xbf16>
    %cst_29 = arith.constant dense<0.000000e+00> : vector<8x256xf32>
    %62 = tpu.matmul %61, %59, %cst_29 {dimension_numbers = #tpu.dot_dimension_numbers<[1], [0], [0], [1], [0, 0, 1, 1], [], []>} : vector<8x16xbf16>, vector<16x256xbf16>, vector<8x256xf32> -> vector<8x256xf32>
    %c1_30 = arith.constant 1 : index
    %c0_31 = arith.constant 0 : index
    %c0_32 = arith.constant 0 : index
    %63 = vector.load %arg4[%c1_30, %c0_31, %c0_32] : memref<6x8x1xf32, #tpu.memory_space<vmem>>, vector<1x8x1xf32>
    %64 = vector.shape_cast %63 : vector<1x8x1xf32> to vector<8x1xf32>
    %65 = vector.broadcast %64 : vector<8x1xf32> to vector<8x256xf32>
    %66 = arith.addf %62, %65 : vector<8x256xf32>
    %cst_33 = arith.constant 0.000000e+00 : f32
    %67 = vector.broadcast %cst_33 : f32 to vector<8x256xf32>
    %68 = arith.maximumf %66, %67 : vector<8x256xf32>
    %69 = arith.addf %68, %32 : vector<8x256xf32>
    %cst_34 = arith.constant 0.000000e+00 : f32
    %70 = vector.broadcast %cst_34 : f32 to vector<8x256xf32>
    %71 = arith.maximumf %69, %70 : vector<8x256xf32>
    %c0_35 = arith.constant 0 : index
    %c0_36 = arith.constant 0 : index
    %72 = vector.load %arg8[%c0_35, %c0_36] : memref<8x256xf32, #tpu.memory_space<vmem>>, vector<8x256xf32>
    tpu.vector_store %arg8[%c0_35, %c0_36], %71 {strides = array<i32>} : memref<8x256xf32, #tpu.memory_space<vmem>>, vector<8x256xf32>,
    %c0_37 = arith.constant 0 : index
    %c0_38 = arith.constant 0 : index
    %73 = vector.load %arg8[%c0_37, %c0_38] : memref<8x256xf32, #tpu.memory_space<vmem>>, vector<8x256xf32>
    %74 = arith.truncf %73 : vector<8x256xf32> to vector<8x256xbf16>
    %75 = vector.extract_strided_slice %74 {offsets = [0, 254], sizes = [8, 2], strides = [1, 1]} : vector<8x256xbf16> to vector<8x2xbf16>
    %76 = vector.extract_strided_slice %74 {offsets = [0, 0], sizes = [8, 254], strides = [1, 1]} : vector<8x256xbf16> to vector<8x254xbf16>
    %77 = tpu.concatenate %75, %76 in 1 : vector<8x2xbf16>, vector<8x254xbf16> -> vector<8x256xbf16>
    %c2_i32_39 = arith.constant 2 : i32
    %78 = arith.subi %c2_i32_39, %31 : i32
    %79 = vector.broadcast %78 : i32 to vector<1x256xi32>
    %80 = arith.cmpi sge, %29, %79 : vector<1x256xi32>
    %c0_i32_40 = arith.constant 0 : i32
    %81 = arith.sitofp %c0_i32_40 : i32 to bf16
    %82 = vector.shape_cast %80 : vector<1x256xi1> to vector<1x256xi1>
    %83 = vector.broadcast %82 : vector<1x256xi1> to vector<8x256xi1>
    %84 = vector.broadcast %81 : bf16 to vector<8x256xbf16>
    %85 = arith.select %83, %77, %84 : vector<8x256xi1>, vector<8x256xbf16>
    %86 = tpu.concatenate %85, %74 in 0 : vector<8x256xbf16>, vector<8x256xbf16> -> vector<16x256xbf16>
    %c2 = arith.constant 2 : index
    %c0_41 = arith.constant 0 : index
    %c0_42 = arith.constant 0 : index
    %87 = vector.load %arg3[%c2, %c0_41, %c0_42] : memref<6x8x16xbf16, #tpu.memory_space<vmem>>, vector<1x8x16xbf16>
    %88 = vector.shape_cast %87 : vector<1x8x16xbf16> to vector<8x16xbf16>
    %cst_43 = arith.constant dense<0.000000e+00> : vector<8x256xf32>
    %89 = tpu.matmul %88, %86, %cst_43 {dimension_numbers = #tpu.dot_dimension_numbers<[1], [0], [0], [1], [0, 0, 1, 1], [], []>} : vector<8x16xbf16>, vector<16x256xbf16>, vector<8x256xf32> -> vector<8x256xf32>
    %c2_44 = arith.constant 2 : index
    %c0_45 = arith.constant 0 : index
    %c0_46 = arith.constant 0 : index
    %90 = vector.load %arg4[%c2_44, %c0_45, %c0_46] : memref<6x8x1xf32, #tpu.memory_space<vmem>>, vector<1x8x1xf32>
    %91 = vector.shape_cast %90 : vector<1x8x1xf32> to vector<8x1xf32>
    %92 = vector.broadcast %91 : vector<8x1xf32> to vector<8x256xf32>
    %93 = arith.addf %89, %92 : vector<8x256xf32>
    %cst_47 = arith.constant 0.000000e+00 : f32
    %94 = vector.broadcast %cst_47 : f32 to vector<8x256xf32>
    %95 = arith.maximumf %93, %94 : vector<8x256xf32>
    %96 = arith.truncf %95 : vector<8x256xf32> to vector<8x256xbf16>
    %97 = vector.extract_strided_slice %96 {offsets = [0, 254], sizes = [8, 2], strides = [1, 1]} : vector<8x256xbf16> to vector<8x2xbf16>
    %98 = vector.extract_strided_slice %96 {offsets = [0, 0], sizes = [8, 254], strides = [1, 1]} : vector<8x256xbf16> to vector<8x254xbf16>
    %99 = tpu.concatenate %97, %98 in 1 : vector<8x2xbf16>, vector<8x254xbf16> -> vector<8x256xbf16>
    %c2_i32_48 = arith.constant 2 : i32
    %100 = arith.subi %c2_i32_48, %31 : i32
    %101 = vector.broadcast %100 : i32 to vector<1x256xi32>
    %102 = arith.cmpi sge, %29, %101 : vector<1x256xi32>
    %c0_i32_49 = arith.constant 0 : i32
    %103 = arith.sitofp %c0_i32_49 : i32 to bf16
    %104 = vector.shape_cast %102 : vector<1x256xi1> to vector<1x256xi1>
    %105 = vector.broadcast %104 : vector<1x256xi1> to vector<8x256xi1>
    %106 = vector.broadcast %103 : bf16 to vector<8x256xbf16>
    %107 = arith.select %105, %99, %106 : vector<8x256xi1>, vector<8x256xbf16>
    %108 = tpu.concatenate %107, %96 in 0 : vector<8x256xbf16>, vector<8x256xbf16> -> vector<16x256xbf16>
    %c3 = arith.constant 3 : index
    %c0_50 = arith.constant 0 : index
    %c0_51 = arith.constant 0 : index
    %109 = vector.load %arg3[%c3, %c0_50, %c0_51] : memref<6x8x16xbf16, #tpu.memory_space<vmem>>, vector<1x8x16xbf16>
    %110 = vector.shape_cast %109 : vector<1x8x16xbf16> to vector<8x16xbf16>
    %cst_52 = arith.constant dense<0.000000e+00> : vector<8x256xf32>
    %111 = tpu.matmul %110, %108, %cst_52 {dimension_numbers = #tpu.dot_dimension_numbers<[1], [0], [0], [1], [0, 0, 1, 1], [], []>} : vector<8x16xbf16>, vector<16x256xbf16>, vector<8x256xf32> -> vector<8x256xf32>
    %c3_53 = arith.constant 3 : index
    %c0_54 = arith.constant 0 : index
    %c0_55 = arith.constant 0 : index
    %112 = vector.load %arg4[%c3_53, %c0_54, %c0_55] : memref<6x8x1xf32, #tpu.memory_space<vmem>>, vector<1x8x1xf32>
    %113 = vector.shape_cast %112 : vector<1x8x1xf32> to vector<8x1xf32>
    %114 = vector.broadcast %113 : vector<8x1xf32> to vector<8x256xf32>
    %115 = arith.addf %111, %114 : vector<8x256xf32>
    %cst_56 = arith.constant 0.000000e+00 : f32
    %116 = vector.broadcast %cst_56 : f32 to vector<8x256xf32>
    %117 = arith.maximumf %115, %116 : vector<8x256xf32>
    %118 = arith.addf %117, %73 : vector<8x256xf32>
    %cst_57 = arith.constant 0.000000e+00 : f32
    %119 = vector.broadcast %cst_57 : f32 to vector<8x256xf32>
    %120 = arith.maximumf %118, %119 : vector<8x256xf32>
    %c0_58 = arith.constant 0 : index
    %c0_59 = arith.constant 0 : index
    %121 = vector.load %arg8[%c0_58, %c0_59] : memref<8x256xf32, #tpu.memory_space<vmem>>, vector<8x256xf32>
    tpu.vector_store %arg8[%c0_58, %c0_59], %120 {strides = array<i32>} : memref<8x256xf32, #tpu.memory_space<vmem>>, vector<8x256xf32>,
    %c0_60 = arith.constant 0 : index
    %c0_61 = arith.constant 0 : index
    %122 = vector.load %arg8[%c0_60, %c0_61] : memref<8x256xf32, #tpu.memory_space<vmem>>, vector<8x256xf32>
    %123 = arith.truncf %122 : vector<8x256xf32> to vector<8x256xbf16>
    %124 = vector.extract_strided_slice %123 {offsets = [0, 252], sizes = [8, 4], strides = [1, 1]} : vector<8x256xbf16> to vector<8x4xbf16>
    %125 = vector.extract_strided_slice %123 {offsets = [0, 0], sizes = [8, 252], strides = [1, 1]} : vector<8x256xbf16> to vector<8x252xbf16>
    %126 = tpu.concatenate %124, %125 in 1 : vector<8x4xbf16>, vector<8x252xbf16> -> vector<8x256xbf16>
    %c4_i32 = arith.constant 4 : i32
    %127 = arith.subi %c4_i32, %31 : i32
    %128 = vector.broadcast %127 : i32 to vector<1x256xi32>
    %129 = arith.cmpi sge, %29, %128 : vector<1x256xi32>
    %c0_i32_62 = arith.constant 0 : i32
    %130 = arith.sitofp %c0_i32_62 : i32 to bf16
    %131 = vector.shape_cast %129 : vector<1x256xi1> to vector<1x256xi1>
    %132 = vector.broadcast %131 : vector<1x256xi1> to vector<8x256xi1>
    %133 = vector.broadcast %130 : bf16 to vector<8x256xbf16>
    %134 = arith.select %132, %126, %133 : vector<8x256xi1>, vector<8x256xbf16>
    %135 = tpu.concatenate %134, %123 in 0 : vector<8x256xbf16>, vector<8x256xbf16> -> vector<16x256xbf16>
    %c4 = arith.constant 4 : index
    %c0_63 = arith.constant 0 : index
    %c0_64 = arith.constant 0 : index
    %136 = vector.load %arg3[%c4, %c0_63, %c0_64] : memref<6x8x16xbf16, #tpu.memory_space<vmem>>, vector<1x8x16xbf16>
    %137 = vector.shape_cast %136 : vector<1x8x16xbf16> to vector<8x16xbf16>
    %cst_65 = arith.constant dense<0.000000e+00> : vector<8x256xf32>
    %138 = tpu.matmul %137, %135, %cst_65 {dimension_numbers = #tpu.dot_dimension_numbers<[1], [0], [0], [1], [0, 0, 1, 1], [], []>} : vector<8x16xbf16>, vector<16x256xbf16>, vector<8x256xf32> -> vector<8x256xf32>
    %c4_66 = arith.constant 4 : index
    %c0_67 = arith.constant 0 : index
    %c0_68 = arith.constant 0 : index
    %139 = vector.load %arg4[%c4_66, %c0_67, %c0_68] : memref<6x8x1xf32, #tpu.memory_space<vmem>>, vector<1x8x1xf32>
    %140 = vector.shape_cast %139 : vector<1x8x1xf32> to vector<8x1xf32>
    %141 = vector.broadcast %140 : vector<8x1xf32> to vector<8x256xf32>
    %142 = arith.addf %138, %141 : vector<8x256xf32>
    %cst_69 = arith.constant 0.000000e+00 : f32
    %143 = vector.broadcast %cst_69 : f32 to vector<8x256xf32>
    %144 = arith.maximumf %142, %143 : vector<8x256xf32>
    %145 = arith.truncf %144 : vector<8x256xf32> to vector<8x256xbf16>
    %146 = vector.extract_strided_slice %145 {offsets = [0, 252], sizes = [8, 4], strides = [1, 1]} : vector<8x256xbf16> to vector<8x4xbf16>
    %147 = vector.extract_strided_slice %145 {offsets = [0, 0], sizes = [8, 252], strides = [1, 1]} : vector<8x256xbf16> to vector<8x252xbf16>
    %148 = tpu.concatenate %146, %147 in 1 : vector<8x4xbf16>, vector<8x252xbf16> -> vector<8x256xbf16>
    %c4_i32_70 = arith.constant 4 : i32
    %149 = arith.subi %c4_i32_70, %31 : i32
    %150 = vector.broadcast %149 : i32 to vector<1x256xi32>
    %151 = arith.cmpi sge, %29, %150 : vector<1x256xi32>
    %c0_i32_71 = arith.constant 0 : i32
    %152 = arith.sitofp %c0_i32_71 : i32 to bf16
    %153 = vector.shape_cast %151 : vector<1x256xi1> to vector<1x256xi1>
    %154 = vector.broadcast %153 : vector<1x256xi1> to vector<8x256xi1>
    %155 = vector.broadcast %152 : bf16 to vector<8x256xbf16>
    %156 = arith.select %154, %148, %155 : vector<8x256xi1>, vector<8x256xbf16>
    %157 = tpu.concatenate %156, %145 in 0 : vector<8x256xbf16>, vector<8x256xbf16> -> vector<16x256xbf16>
    %c5 = arith.constant 5 : index
    %c0_72 = arith.constant 0 : index
    %c0_73 = arith.constant 0 : index
    %158 = vector.load %arg3[%c5, %c0_72, %c0_73] : memref<6x8x16xbf16, #tpu.memory_space<vmem>>, vector<1x8x16xbf16>
    %159 = vector.shape_cast %158 : vector<1x8x16xbf16> to vector<8x16xbf16>
    %cst_74 = arith.constant dense<0.000000e+00> : vector<8x256xf32>
    %160 = tpu.matmul %159, %157, %cst_74 {dimension_numbers = #tpu.dot_dimension_numbers<[1], [0], [0], [1], [0, 0, 1, 1], [], []>} : vector<8x16xbf16>, vector<16x256xbf16>, vector<8x256xf32> -> vector<8x256xf32>
    %c5_75 = arith.constant 5 : index
    %c0_76 = arith.constant 0 : index
    %c0_77 = arith.constant 0 : index
    %161 = vector.load %arg4[%c5_75, %c0_76, %c0_77] : memref<6x8x1xf32, #tpu.memory_space<vmem>>, vector<1x8x1xf32>
    %162 = vector.shape_cast %161 : vector<1x8x1xf32> to vector<8x1xf32>
    %163 = vector.broadcast %162 : vector<8x1xf32> to vector<8x256xf32>
    %164 = arith.addf %160, %163 : vector<8x256xf32>
    %cst_78 = arith.constant 0.000000e+00 : f32
    %165 = vector.broadcast %cst_78 : f32 to vector<8x256xf32>
    %166 = arith.maximumf %164, %165 : vector<8x256xf32>
    %167 = arith.addf %166, %122 : vector<8x256xf32>
    %cst_79 = arith.constant 0.000000e+00 : f32
    %168 = vector.broadcast %cst_79 : f32 to vector<8x256xf32>
    %169 = arith.maximumf %167, %168 : vector<8x256xf32>
    %c0_80 = arith.constant 0 : index
    %c0_81 = arith.constant 0 : index
    %170 = vector.load %arg8[%c0_80, %c0_81] : memref<8x256xf32, #tpu.memory_space<vmem>>, vector<8x256xf32>
    tpu.vector_store %arg8[%c0_80, %c0_81], %169 {strides = array<i32>} : memref<8x256xf32, #tpu.memory_space<vmem>>, vector<8x256xf32>,
    %c0_82 = arith.constant 0 : index
    %c128 = arith.constant 128 : index
    %171 = vector.load %arg8[%c0_82, %c128] : memref<8x256xf32, #tpu.memory_space<vmem>>, vector<8x128xf32>
    %c0_83 = arith.constant 0 : index
    %c0_84 = arith.constant 0 : index
    %c0_85 = arith.constant 0 : index
    %172 = vector.load %arg5[%c0_83, %c0_84, %c0_85] : memref<1x8x128xf32, #tpu.memory_space<vmem>>, vector<1x8x128xf32>
    %173 = vector.shape_cast %172 : vector<1x8x128xf32> to vector<8x128xf32>
    %174 = vector.shape_cast %171 : vector<8x128xf32> to vector<1x8x128xf32>
    tpu.vector_store %arg5[%c0_83, %c0_84, %c0_85], %174 {strides = array<i32>} : memref<1x8x128xf32, #tpu.memory_space<vmem>>, vector<1x8x128xf32>,
    return
  }
  func.func @transform_1(%arg0: i32, %arg1: i32) -> (i32, i32, i32) {
    %c0_i32 = arith.constant 0 : i32
    %c0_i32_0 = arith.constant 0 : i32
    %c0_i32_1 = arith.constant 0 : i32
    %c0_i32_2 = arith.constant 0 : i32
    return %c0_i32, %c0_i32_0, %c0_i32_1 : i32, i32, i32
  }
  func.func @transform_2(%arg0: i32, %arg1: i32) -> (i32, i32, i32) {
    %c0_i32 = arith.constant 0 : i32
    %c0_i32_0 = arith.constant 0 : i32
    %c0_i32_1 = arith.constant 0 : i32
    %c0_i32_2 = arith.constant 0 : i32
    return %c0_i32, %c0_i32_0, %c0_i32_1 : i32, i32, i32
  }
  func.func @transform_3(%arg0: i32, %arg1: i32) -> (i32, i32, i32) {
    %c0_i32 = arith.constant 0 : i32
    %c0_i32_0 = arith.constant 0 : i32
    return %arg0, %c0_i32, %arg1 : i32, i32, i32
  }
}

</mosaic_0001>

<bundles_post_ra>
// kernel: tpu_custom_call.1
= control target key start
LH: loop header
LB: loop body
LE: loop exit
PB: predicated region body
PF: predicated region fallthrough
CT: control target
= control target key end

     0   :  { %s1660_s0 = inlined_call_operand.vmem [shape: f32[2,8,384], index: 0, kind: input, shape index: {}]   ;;  %s1661_s1 = inlined_call_operand.hbm [shape: bf16[6,8,16], index: 1, kind: input, shape index: {}]   ;;  %s1662_s2 = inlined_call_operand.vmem [shape: f32[6,8,1], index: 2, kind: input, shape index: {}]   ;;  %s1663_s3 = inlined_call_operand.hbm [shape: f32[2,8,256], index: 3, kind: output, shape index: {}]  }
   0x1   :  { %1670 = sst [smem:[#allocation15_spill]] %s1661_s1 }
   0x2   :  { %8 = vsyncpa [#allocation6], 0 }
   0x3   :  { %9 = vsyncpa [#allocation7], 0 }
   0x4   :  { %11 = vsyncpa [#allocation7 + $0x1], 0  ;;  %s1304_s12 = smov 0   ;;  %s1306_s13 = smov 0  }
   0x5   :  { %s1308_s14 = smov 0   ;;  %s1310_s15 = smov 0  }
   0x6   :  { %s1312_s16 = smov 0   ;;  %s1314_s17 = smov 0  }
   0x7   :  { %s1316_s18 = smov 0   ;;  %s1318_s19 = smov 0  }
   0x8 LB: > { %s1010_s20 = sadd.s32 4294967295, %s1274_s19   ;;  %s1011_s21 = sadd.s32 4294967294, %s1274_s19   ;;  %s1274_s19 = sphi %s1318_s19, %s17_s19   ;;  %s1270_s18 = sphi %s1316_s18, %s1700_s18   ;;  %s1266_s17 = sphi %s1314_s17, %s1699_s17   ;;  %s1262_s16 = sphi %s1312_s16, %s1698_s16   ;;  %s1258_s15 = sphi %s1310_s15, %s1697_s15   ;;  %s1254_s14 = sphi %s1308_s14, %s1696_s14   ;;  %s1250_s13 = sphi %s1306_s13, %s1695_s13   ;;  %s1246_s12 = sphi %s1304_s12, %s1694_s12  }
   0x9   : > { %s26_s22 = sadd.s32 1, %s1266_s17  ;;  %s29_s23 = sadd.s32 1, %s1270_s18 }
   0xa   : > { %p27_p0 = scmp.ge.s32.totalorder %s26_s22, 2  ;;  %s80_s24 = sadd.s32 1, %s1254_s14 }
   0xb   : > { %p90_p1 = scmp.ne.s32.totalorder %s1254_s14, %s1250_s13  ;;  %p91_p2 = scmp.eq.s32.totalorder %s1010_s20, 3 }
   0xc   : > { %s1702_s22 = smov (%p27_p0, %s26_s22), 0  ;;  %s1704_s23 = smov (!%p27_p0, %s29_s23), %s1270_s18 }
   0xd   : > { %s76_s25 = ssub.s32 %s1266_s17, %s1702_s22  ;;  %p1356_p3 = por %p91_p2, %p90_p1 }
   0xe   : > { %p31_p4 = scmp.ge.s32.totalorder %s1704_s23, 2  ;;  %p96_p5 = scmp.ne.s32.totalorder %s1250_s13, %s1246_s12 }
   0xf   : > { %s1671_s26 = scalar_select %p1356_p3, 1, 0 }
  0x10   : > { %p97_p6 = scmp.eq.s32.totalorder %s1011_s21, 3  ;;  %p1012_p7 = scmp.ge.s32.totalorder %s1274_s19, 1 }
  0x11   : > { %s1706_s23 = smov (%p31_p4, %s1704_s23), 0  ;;  %p104_p9 = scmp.lt.s32.totalorder %s1274_s19, 5 }
  0x12   : > { %1672 = sst [smem:[#allocation14_spill]] %s1706_s23  ;;  %p1365_p8 = por %p97_p6, %p96_p5 }
  0x13   : > { %s75_s28 = ssub.s32 %s1270_s18, %s1706_s23  ;;  %p1372_p10 = pnand %p1012_p7, %p104_p9 }
  0x14   : > { %s1673_s27 = scalar_select %p1365_p8, 1, 0 }
  0x15   : > { %s77_s29 = sor.u32 %s76_s25, %s75_s28  ;;  %p1376_p12 = scmp.eq.s32.totalorder %s1010_s20, 0 }
  0x16   : > { %s1674_s30 = scalar_select %p1372_p10, 1, 0 }
  0x17   : > { %p78_p11 = scmp.eq.s32.totalorder %s77_s29, 0  ;;  %p1062_p13 = pneg %p1372_p10 }
  0x18   : > { %s1675_s4 = scalar_select %p1376_p12, 1, 0 }
  0x19   : > { %s1383_s5 = scalar_select %p78_p11, %s1254_s14, %s80_s24  }
  0x1a   : > { %s1276_s6 = smov [#allocation5]   ;;  %p1387_p0 = pnand %p1376_p12, %p1062_p13 }
  0x1b   : > { %s116_s7 = sshll.u32 %s1276_s6, 4  ;;  %s1677_s1 = sld [smem:[#allocation15_spill]]  ;;  %s117_s7 = int_to_ptr.vmem [resolvable:$true] %s116_s7 }
  0x1c   : > { %p1148_p2 = pneg %p1387_p0 }
  0x21   : > { %s1146_s11 = scalar_lea.hbm %s1677_s1, 384 }
  0x22   : > { %p1147_p1 = scmp.ne.s32.totalorder %s1677_s1, %s1146_s11  ;;  %p1153_p6 = scmp.lt.u32.totalorder %s1146_s11, %s1677_s1 }
  0x24   : > { %p1149_p4 = pnand %p1148_p2, %p1147_p1 }
  0x26   : > { %p1150_p5 = pneg %p1149_p4 }
  0x28   : > { %p1155_p7 = pnand %p1153_p6, %p1150_p5 }
  0x2a   : > { %1158 = shalt.err (!%p1155_p7)
}
  0x2b   : > { %s1159_s28 = scalar_lea.vmem %s117_s7, 384  ;;  %p1167_p8 = scmp.lt.s32.totalorder %s117_s7, %s117_s7 }
  0x2c   : > { %p1160_p9 = scmp.ne.s32.totalorder %s117_s7, %s1159_s28  ;;  %p1168_p3 = scmp.lt.s32.totalorder %s1159_s28, %s1159_s28 }
  0x2e   : > { %p1162_p11 = pnand %p1160_p9, %p1148_p2  ;;  %p1169_p12 = por %p1168_p3, %p1167_p8 }
  0x30   : > { %p1163_p13 = pneg %p1162_p11 }
  0x32   : > { %p1170_p10 = pnand %p1169_p12, %p1163_p13 }
  0x34   : > { %1173 = shalt.err (!%p1170_p10)
}
  0x35   : > { %s1277_s29 = smov 64   ;;  %s1278_s6 = smov 4  }
  0x36   : > { %1065 = dma.hbm_to_vmem [thread:$0]  (!%p1387_p0), %s1677_s1, 384, %s117_s7, [#allocation6], %s1277_s29, %s1277_s29, %s1278_s6  }
  0x37   : > { %p1678_p1 = scmp.ne.s32.totalorder %s1674_s30, 0 }
  0x38   : > { %p1679_p4 = scmp.ne.s32.totalorder (!%p1678_p1), %s1675_s4, 0 }
  0x39   : > { %135 = sbr.rel (%p1678_p1) target bundleno = 2181 (0x885), region = 28 }
  0x40   : > { %1235 = dma.done.wait (%p1679_p4), [#allocation6], 384  }
  0x41   : > { %1237 = vsyncadd (%p1679_p4), [#allocation6], 4294966912  ;;  %s1668_s11 = sand.u32 1, %s1250_s13   ;;  %p155_p3 = scmp.lt.s32.totalorder %s1258_s15, 0 }
  0x42   : > { %s1417_s8 = sshll.u32 %s1668_s11, 3  ;;  %s156_s7 = ssub.s32 0, %s1258_s15 }
  0x43   : > { %s1017_s30 = smin.u32 %s1258_s15, %s156_s7  ;;  %p1020_p10 = scmp.ne.s32.totalorder %s1258_s15, 0 }
  0x44   : > { %s158_s20 = sand.u32 1, %s1017_s30   ;;  %s1021_s25 = sshll.u32 (!%p1020_p10), %s1258_s15, 7 }
  0x45   : > { %s159_s21 = ssub.s32 0, %s158_s20  ;;  %170 = sbr.rel (%p1020_p10) target bundleno = 79 (0x4f), region = 36 }
  0x46   : > { %s1708_s21 = smov (!%p155_p3, %s159_s21), %s158_s20  ;;  %s174_s28 = smul.u32 (!%p1020_p10), 3, %s1262_s16 }
  0x47   : > { %p1019_p8 = scmp.lt.s32.totalorder %s1708_s21, 0  ;;  %s165_s24 = sadd.s32 2, %s1708_s21 }
  0x48   : > { %s172_s29 = sshra.s32 (!%p1020_p10), %s1021_s25, 7 }
  0x49   : > { %s1710_s24 = smov (!%p1019_p8, %s165_s24), %s1708_s21  ;;  %s175_s9 = sadd.s32 (!%p1020_p10), %s174_s28, %s172_s29 }
  0x4a   : > { %s1051_s6 = sshll.u32 (!%p1020_p10), %s1710_s24, 4  ;;  %s1022_s10 = sshll.u32 (!%p1020_p10), %s175_s9, 3 }
  0x4b   : > { %s177_s20 = scalar_lea.vmem (!%p1020_p10), %s1660_s0, %s1022_s10  ;;  %s180_s21 = scalar_lea.vmem (!%p1020_p10), [#allocation2], %s1051_s6 }
  0x4c   : > { %v214_v0 = vld [vmem:[%s177_s20] sm:$0xff]  ;;  %v216_v1 = vld [vmem:[%s177_s20 + $0x8] sm:$0xff]  ;;  %s181_s11 = scalar_lea.sflag [#allocation3], %s1710_s24 }
  0x4d   : > { %215 = vst [vmem:[%s180_s21] sm:$0xff] %v214_v0  ;;  %217 = vst [vmem:[%s180_s21 + $0x8] sm:$0xff] %v216_v1 }
  0x4e   : > { %225 = vsyncadd %s181_s11, 256 }
  0x4f PF: > { %s1433_s4 = sshll.u32 %s1258_s15, 7  ;;  %s1052_s25 = sshll.u32 %s1710_s24, 4 }
  0x50   : > { %s229_s28 = scalar_lea.vmem [#allocation2], %s1052_s25  ;;  %s230_s29 = scalar_lea.sflag [#allocation3], %s1710_s24 }
  0x51   : > { %1238 = dma.done.wait %s230_s29, 256 }
  0x52   : > { %1239 = vsyncadd %s230_s29, 4294967040  ;;  %s235_s9 = sadd.s32 1, %s1258_s15 }
  0x53   : > { %p1028_p12 = scmp.ge.s32.totalorder %s235_s9, 2 }
  0x54   : > { %s240_s6 = ssub.s32 (!%p1028_p12), 1, %s1710_s24  ;;  %s1054_s11 = sadd.s32 (!%p1028_p12), 128, %s1433_s4 }
  0x55   : > { %239 = sbr.rel (%p1028_p12) target bundleno = 94 (0x5e), region = 74  ;;  %s242_s10 = sshra.s32 (!%p1028_p12), %s1054_s11, 7 }
  0x56   : > { %s244_s7 = smul.u32 (!%p1028_p12), 3, %s1262_s16  ;;  %s1055_s30 = sshll.u32 (!%p1028_p12), %s240_s6, 4 }
  0x57   : > { %s250_s29 = scalar_lea.vmem (!%p1028_p12), [#allocation2], %s1055_s30  ;;  %s251_s9 = scalar_lea.sflag (!%p1028_p12), [#allocation3], %s240_s6 }
  0x58   : > { %s245_s20 = sadd.s32 (!%p1028_p12), %s244_s7, %s242_s10 }
  0x59   : > { %s1030_s21 = sshll.u32 (!%p1028_p12), %s245_s20, 3 }
  0x5a   : > { %s247_s25 = scalar_lea.vmem (!%p1028_p12), %s1660_s0, %s1030_s21 }
  0x5b   : > { %v284_v2 = vld [vmem:[%s247_s25] sm:$0xff] (!%p1028_p12)  ;;  %v286_v3 = vld [vmem:[%s247_s25 + $0x8] sm:$0xff] (!%p1028_p12) }
  0x5c   : > { %285 = vst [vmem:[%s250_s29] sm:$0xff] %v284_v2  ;;  %287 = vst [vmem:[%s250_s29 + $0x8] sm:$0xff] %v286_v3 }
  0x5d   : > { %295 = vsyncadd %s251_s9, 256 }
  0x5e PF: > { %v1279_v7 = vmov 0   ;;  %v330_v8 = vld [vmem:[%s1662_s2] sm:$0xff]  ;;  %s1280_s24 = smov 1   ;;  %vm313_vm0 = vcmask 7168   ;;  %vm321_vm1 = vcmask 1043456   ;;  %vm336_vm2 = vcmask 130048  }
  0x5f   : > { %372 = vmatprep.mubr.bf16.mxu0 %v1279_v7  ;;  %1144 = vset.pattern.permute.xlu1 %v1279_v7  ;;  %v329_v18 = vld [vmem:[#allocation5] sm:$0xf]  ;;  %v1034_v30 = vld [vmem:[%s1662_s2 + $0x8] sm:$0xff]  ;;  %v300_v31 = vlaneseq  ;;  %s397_s11 = ssub.s32 129, %s1433_s4  ;;  %v430_v51 = vld [vmem:[#allocation5 + $0x4] sm:$0xf] }
  0x60   : > { %333 = vperm.xlu1 %1144, %v330_v8   ;;  %473 = vmatprep.mubr.bf16.mxu1 %v1279_v7  ;;  %v398_v34 = vstv %s397_s11  ;;  %s1281_s10 = smov 2   ;;  %v1036_v3 = vld [vmem:[%s1662_s2 + $0x10] sm:$0xff]  ;;  %s508_s25 = ssub.s32 130, %s1433_s4  ;;  %vm500_vm11 = vcmask 15360  }
  0x61   : > { %1145 = vset.pattern.permute.xlu0 %v1279_v7  ;;  %v1472_v32 = vand.u32 127, %v300_v31  ;;  %v408_v35 = vshrl.u32 %v300_v31, 7  ;;  %s1282_s29 = smov 4   ;;  %s700_s23 = ssub.s32 132, %s1433_s4 }
  0x62   : > { %p1691_p2 = scmp.ne.s32.totalorder %s1671_s26, 0  ;;  %s1283_s9 = smov [#allocation8]  }
  0x63   : > { %v1476_v33 = vadd.s32 128, %v1472_v32  ;;  %vm399_vm3 = vcmp.ge.s32.totalorder %v1472_v32, %v398_v34  ;;  %v1480_v36 = vsub.s32 4, %v408_v35  ;;  %v1482_v37 = vsub.s32 0, %v408_v35  ;;  %s1178_s1 = sshll.u32 %s1283_s9, 4  ;;  %s1179_s1 = int_to_ptr.vmem [resolvable:$false] %s1178_s1 }
  0x65   : > { %v1444_v4 = vld [vmem:[%s229_s28 + $0x8] sm:$0xff]  ;;  %v1446_v5 = vld [vmem:[%s229_s28] sm:$0xff]  ;;  %vm400_vm4 = vcmp.ge.s32.totalorder %v1476_v33, %v398_v34  ;;  %s1045_s28 = sshll.u32 %s1262_s16, 1 }
  0x66   : > { %v306_v6 = vpack.c.bf16 %v1444_v4, %v1444_v4  ;;  %v305_v9 = vpack.c.bf16 %v1446_v5, %v1446_v5  ;;  %vm405_vm5 = vmpackc.low %vm400_vm4, %vm399_vm3  ;;  %vm692_vm3 = vcmask 31744   ;;  %s888_s6 = sadd.s32 %s1258_s15, %s1045_s28  ;;  %s1690_s15 = sand.u32 1, %s1250_s13  }
  0x67   : > { %v406_v38 = vsel %vm405_vm5, 65537, %v1279_v7  ;;  %s1046_s11 = sshll.u32 %s888_s6, 7 }
  0x68   : > { %308 = vrot.lane.b32.xlu0 %v306_v6, %s1280_s24  ;;  %v320_v11 = vrot.slane %v306_v6, 4  ;;  %v319_v12 = vrot.slane %v305_v9, 4  ;;  %v414_v39 = vrot.slane %v406_v38, %v1480_v36  ;;  %v410_v40 = vrot.slane %v406_v38, %v1482_v37  ;;  %s1603_s16 = scalar_lea.hbm %s1663_s3, %s1046_s11 }
  0x6a   : > { %vm416_vm6 = vcmp.ne.s16.totalorder %v414_v39, 0  ;;  %vm415_vm7 = vcmp.ne.s16.totalorder %v410_v40, 0 }
  0x6c   : > { %311 = vrot.lane.b32.xlu0 %v305_v9, %s1280_s24 }
  0xda   : > { %v309_v10 = vpop.permute.xlu0 %308 }
  0xde   : > { %v312_v13 = vpop.permute.xlu0 %311 }
  0xdf   : > { %v314_v14 = vsel %vm313_vm0, %v312_v13, %v309_v10  ;;  %v318_v15 = vsel %vm313_vm0, %v309_v10, %v312_v13  ;;  %v334_v19 = vpop.permute.xlu1 %333 }
  0xe0   : > { %v327_v16 = vsel %vm321_vm1, %v314_v14, %v320_v11  ;;  %v323_v17 = vsel %vm321_vm1, %v318_v15, %v319_v12 }
  0xe1   : > { %340 = vmatprep.subr.bf16.mxu0 %v327_v16 }
  0xe2   : > { %341 = vmatpush1.bf16.msra.mxu0 %v323_v17 }
  0xe5   : > { %1033 = vmatmul.mubr.msk.bf16.vlgmr.msra.gmra.mrb[0].mxu0 %vm336_vm2, %v329_v18 }
  0xe6   : > { %584 = vmatprep.mubr.bf16.mxu0 %v1279_v7 }
 0x1b8   : > { %v374_v20 = vpop.f32.mrb[0].mxu0 }
 0x1b9   : > { %v375_v21 = vadd.f32 %v374_v20, %v334_v19  ;;  %v376_v22 = vpop.f32.mrb[1].mxu0 }
 0x1ba   : > { %v377_v23 = vadd.f32 %v376_v22, %v334_v19  ;;  %v378_v24 = vpop.f32.mrb[2].mxu0  ;;  %v541_v22 = vld [vmem:[#allocation5 + $0x8] sm:$0xf] }
 0x1bb   : > { %v381_v25 = vmax.f32 %v375_v21, 0.0  ;;  %v379_v26 = vpop.f32.mrb[3].mxu0 }
 0x1bc   : > { %v382_v27 = vmax.f32 %v377_v23, 0.0 }
 0x1bd   : > { %v383_v28 = vpack.c.bf16 %v381_v25, %v381_v25 }
 0x1be   : > { %v384_v29 = vpack.c.bf16 %v382_v27, %v382_v27 }
 0x1bf   : > { %389 = vrot.lane.b32.xlu0 %v383_v28, %s1280_s24  ;;  %v419_v43 = vrot.slane %v383_v28, 4 }
 0x1c0   : > { %386 = vrot.lane.b32.xlu1 %v384_v29, %s1280_s24  ;;  %v420_v44 = vrot.slane %v384_v29, 4 }
 0x1c4   : > { %435 = vperm.xlu1 %1144, %v1034_v30  }
 0x231   : > { %v390_v41 = vpop.permute.xlu0 %389 }
 0x232   : > { %v387_v42 = vpop.permute.xlu1 %386 }
 0x233   : > { %v391_v45 = vsel %vm313_vm0, %v390_v41, %v387_v42  ;;  %v395_v46 = vsel %vm313_vm0, %v387_v42, %v390_v41 }
 0x234   : > { %v418_v47 = vsel %vm416_vm6, %v391_v45, 0  ;;  %v417_v48 = vsel %vm415_vm7, %v395_v46, 0 }
 0x235   : > { %v427_v49 = vsel %vm321_vm1, %v418_v47, %v420_v44  ;;  %v423_v50 = vsel %vm321_vm1, %v417_v48, %v419_v43  ;;  %v622_v48 = vld [vmem:[#allocation5 + $0xc] sm:$0xf] }
 0x236   : > { %441 = vmatprep.subr.bf16.mxu1 %v427_v49 }
 0x237   : > { %442 = vmatpush1.bf16.msra.mxu1 %v423_v50 }
 0x23a   : > { %1035 = vmatmul.mubr.msk.bf16.vlgmr.msra.gmra.mrb[0].mxu1 %vm336_vm2, %v430_v51 }
 0x23b   : > { %665 = vmatprep.mubr.bf16.mxu1 %v1279_v7 }
 0x243   : > { %v436_v52 = vpop.permute.xlu1 %435 }
 0x30d   : > { %v475_v53 = vpop.f32.mrb[0].mxu1 }
 0x30e   : > { %v476_v54 = vadd.f32 %v475_v53, %v436_v52  ;;  %v477_v55 = vpop.f32.mrb[1].mxu1 }
 0x30f   : > { %v478_v56 = vadd.f32 %v477_v55, %v436_v52  ;;  %v479_v57 = vpop.f32.mrb[2].mxu1 }
 0x310   : > { %v482_v58 = vmax.f32 %v476_v54, 0.0  ;;  %v480_v59 = vpop.f32.mrb[3].mxu1 }
 0x311   : > { %v483_v60 = vmax.f32 %v478_v56, 0.0 }
 0x312   : > { %v484_v61 = vadd.f32 %v482_v58, %v1446_v5  ;;  %v509_v5 = vstv %s508_s25  ;;  %s877_s25 = scalar_lea.sflag [#allocation7], %s1690_s15 }
 0x313   : > { %v485_v62 = vadd.f32 %v483_v60, %v1444_v4  ;;  %v1038_v4 = vld [vmem:[%s1662_s2 + $0x18] sm:$0xff]  ;;  %vm510_vm8 = vcmp.ge.s32.totalorder %v1472_v32, %v509_v5  ;;  %vm511_vm9 = vcmp.ge.s32.totalorder %v1476_v33, %v509_v5 }
 0x314   : > { %v1495_v63 = vmax.f32 %v484_v61, 0.0  ;;  %vm516_vm10 = vmpackc.low %vm511_vm9, %vm510_vm8 }
 0x315   : > { %v1497_v0 = vmax.f32 %v485_v62, 0.0  ;;  %v517_v6 = vsel %vm516_vm10, 65537, %v1279_v7 }
 0x316   : > { %v492_v1 = vpack.c.bf16 %v1495_v63, %v1495_v63  ;;  %v521_v8 = vrot.slane %v517_v6, %v1482_v37  ;;  %v525_v9 = vrot.slane %v517_v6, %v1480_v36 }
 0x317   : > { %v493_v2 = vpack.c.bf16 %v1497_v0, %v1497_v0 }
 0x318   : > { %498 = vrot.lane.b32.xlu1 %v492_v1, %s1281_s10  ;;  %vm1517_vm12 = vcmp.ne.s16.totalorder %v521_v8, 0  ;;  %vm1521_vm13 = vcmp.ne.s16.totalorder %v525_v9, 0  ;;  %v530_v14 = vrot.slane %v492_v1, 4 }
 0x319   : > { %495 = vrot.lane.b32.xlu0 %v493_v2, %s1281_s10  ;;  %v531_v15 = vrot.slane %v493_v2, 4  ;;  %v1040_v2 = vld [vmem:[%s1662_s2 + $0x20] sm:$0xff] }
 0x31d   : > { %546 = vperm.xlu0 %1145, %v1036_v3  }
 0x321   : > { %627 = vperm.xlu0 %1145, %v1038_v4  }
 0x38a   : > { %v499_v10 = vpop.permute.xlu1 %498 }
 0x38b   : > { %v496_v13 = vpop.permute.xlu0 %495 }
 0x38c   : > { %v501_v16 = vsel %vm500_vm11, %v499_v10, %v496_v13  ;;  %v506_v17 = vsel %vm500_vm11, %v496_v13, %v499_v10  ;;  %v733_v13 = vld [vmem:[#allocation5 + $0x10] sm:$0xf] }
 0x38d   : > { %v528_v18 = vsel %vm1517_vm12, %v506_v17, 0  ;;  %v529_v19 = vsel %vm1521_vm13, %v501_v16, 0 }
 0x38e   : > { %v538_v20 = vsel %vm321_vm1, %v529_v19, %v531_v15  ;;  %v534_v21 = vsel %vm321_vm1, %v528_v18, %v530_v14 }
 0x38f   : > { %552 = vmatprep.subr.bf16.mxu0 %v538_v20 }
 0x390   : > { %553 = vmatpush1.bf16.msra.mxu0 %v534_v21 }
 0x393   : > { %1037 = vmatmul.mubr.msk.bf16.vlgmr.msra.gmra.mrb[4].mxu0 %vm336_vm2, %v541_v22 }
 0x394   : > { %776 = vmatprep.mubr.bf16.mxu0 %v1279_v7 }
 0x39c   : > { %v547_v24 = vpop.permute.xlu0 %546 }
 0x3a0   : > { %v628_v49 = vpop.permute.xlu0 %627 }
 0x466   : > { %v586_v23 = vpop.f32.mrb[4].mxu0 }
 0x467   : > { %v588_v25 = vpop.f32.mrb[5].mxu0  ;;  %v587_v26 = vadd.f32 %v586_v23, %v547_v24 }
 0x468   : > { %v589_v27 = vadd.f32 %v588_v25, %v547_v24  ;;  %v590_v28 = vpop.f32.mrb[6].mxu0  ;;  %v1042_v25 = vld [vmem:[%s1662_s2 + $0x28] sm:$0xff] }
 0x469   : > { %v591_v29 = vpop.f32.mrb[7].mxu0  ;;  %v593_v31 = vmax.f32 %v587_v26, 0.0 }
 0x46a   : > { %v594_v30 = vmax.f32 %v589_v27, 0.0 }
 0x46b   : > { %v595_v35 = vpack.c.bf16 %v593_v31, %v593_v31 }
 0x46c   : > { %v596_v34 = vpack.c.bf16 %v594_v30, %v594_v30 }
 0x46d   : > { %v611_v40 = vrot.slane %v595_v35, 4 }
 0x46e   : > { %598 = vrot.lane.b32.xlu1 %v596_v34, %s1281_s10  ;;  %v612_v41 = vrot.slane %v596_v34, 4 }
 0x472   : > { %601 = vrot.lane.b32.xlu1 %v595_v35, %s1281_s10  ;;  %s1688_s10 = scalar_lea.vmem [#allocation8], %s1417_s8 }
 0x473   : > { %s892_s7 = sshll.u32 %s1688_s10, 4  ;;  %s1689_s21 = smov %s1688_s10  ;;  %s1605_s7 = int_to_ptr.vmem [resolvable:$true] %s892_s7 }
 0x474   : > { %p1181_p7 = scmp.lt.s32.totalorder %s1605_s7, %s1179_s1 }
 0x4e0   : > { %v599_v38 = vpop.permute.xlu1 %598 }
 0x4e4   : > { %v602_v39 = vpop.permute.xlu1 %601 }
 0x4e5   : > { %v603_v42 = vsel %vm500_vm11, %v602_v39, %v599_v38  ;;  %v607_v43 = vsel %vm500_vm11, %v599_v38, %v602_v39 }
 0x4e6   : > { %v609_v44 = vsel %vm1517_vm12, %v607_v43, 0  ;;  %v610_v45 = vsel %vm1521_vm13, %v603_v42, 0 }
 0x4e7   : > { %v619_v46 = vsel %vm321_vm1, %v610_v45, %v612_v41  ;;  %v615_v47 = vsel %vm321_vm1, %v609_v44, %v611_v40  ;;  %v814_v40 = vld [vmem:[#allocation5 + $0x14] sm:$0xf] }
 0x4e8   : > { %633 = vmatprep.subr.bf16.mxu1 %v619_v46 }
 0x4e9   : > { %634 = vmatpush1.bf16.msra.mxu1 %v615_v47 }
 0x4ec   : > { %1039 = vmatmul.mubr.msk.bf16.vlgmr.msra.gmra.mrb[4].mxu1 %vm336_vm2, %v622_v48 }
 0x4ed   : > { %857 = vmatprep.mubr.bf16.mxu1 %v1279_v7 }
 0x5bf   : > { %v667_v50 = vpop.f32.mrb[4].mxu1 }
 0x5c0   : > { %v668_v51 = vadd.f32 %v667_v50, %v628_v49  ;;  %v669_v52 = vpop.f32.mrb[5].mxu1 }
 0x5c1   : > { %v670_v53 = vadd.f32 %v669_v52, %v628_v49  ;;  %v671_v54 = vpop.f32.mrb[6].mxu1 }
 0x5c2   : > { %v674_v55 = vmax.f32 %v668_v51, 0.0  ;;  %v672_v56 = vpop.f32.mrb[7].mxu1 }
 0x5c3   : > { %v675_v57 = vmax.f32 %v670_v53, 0.0 }
 0x5c4   : > { %v676_v58 = vadd.f32 %v674_v55, %v1495_v63  ;;  %v701_v63 = vstv %s700_s23  ;;  %s1180_s23 = scalar_lea.vmem %s1179_s1, 256 }
 0x5c5   : > { %v677_v59 = vadd.f32 %v675_v57, %v1497_v0  ;;  %vm702_vm14 = vcmp.ge.s32.totalorder %v1472_v32, %v701_v63  ;;  %vm703_vm15 = vcmp.ge.s32.totalorder %v1476_v33, %v701_v63 }
 0x5c6   : > { %v678_v60 = vmax.f32 %v676_v58, 0.0  ;;  %vm708_vm0 = vmpackc.low %vm703_vm15, %vm702_vm14 }
 0x5c7   : > { %v1549_v61 = vmax.f32 %v677_v59, 0.0  ;;  %v709_v0 = vsel %vm708_vm0, 65537, %v1279_v7 }
 0x5c8   : > { %v684_v62 = vpack.c.bf16 %v678_v60, %v678_v60  ;;  %v713_v3 = vrot.slane %v709_v0, %v1482_v37  ;;  %v717_v4 = vrot.slane %v709_v0, %v1480_v36 }
 0x5c9   : > { %v685_v1 = vpack.c.bf16 %v1549_v61, %v1549_v61 }
 0x5ca   : > { %690 = vrot.lane.b32.xlu0 %v684_v62, %s1282_s29  ;;  %vm1564_vm4 = vcmp.ne.s16.totalorder %v713_v3, 0  ;;  %vm1568_vm5 = vcmp.ne.s16.totalorder %v717_v4, 0  ;;  %v722_v9 = vrot.slane %v684_v62, 4 }
 0x5cb   : > { %687 = vrot.lane.b32.xlu1 %v685_v1, %s1282_s29  ;;  %v723_v33 = vrot.slane %v685_v1, 4 }
 0x5cf   : > { %738 = vperm.xlu1 %1144, %v1040_v2  }
 0x63c   : > { %v691_v5 = vpop.permute.xlu0 %690 }
 0x63d   : > { %v688_v32 = vpop.permute.xlu1 %687 }
 0x63e   : > { %v693_v10 = vsel %vm692_vm3, %v691_v5, %v688_v32  ;;  %v698_v7 = vsel %vm692_vm3, %v688_v32, %v691_v5 }
 0x63f   : > { %v720_v36 = vsel %vm1564_vm4, %v698_v7, 0  ;;  %v721_v37 = vsel %vm1568_vm5, %v693_v10, 0 }
 0x640   : > { %v730_v11 = vsel %vm321_vm1, %v721_v37, %v723_v33  ;;  %v726_v12 = vsel %vm321_vm1, %v720_v36, %v722_v9 }
 0x641   : > { %744 = vmatprep.subr.bf16.mxu0 %v730_v11 }
 0x642   : > { %745 = vmatpush1.bf16.msra.mxu0 %v726_v12 }
 0x645   : > { %1041 = vmatmul.mubr.msk.bf16.vlgmr.msra.gmra.mrb[8].mxu0 %vm336_vm2, %v733_v13 }
 0x64e   : > { %v739_v14 = vpop.permute.xlu1 %738 }
 0x718   : > { %v778_v15 = vpop.f32.mrb[8].mxu0 }
 0x719   : > { %v779_v16 = vadd.f32 %v778_v15, %v739_v14  ;;  %v780_v17 = vpop.f32.mrb[9].mxu0 }
 0x71a   : > { %v781_v18 = vadd.f32 %v780_v17, %v739_v14  ;;  %v782_v19 = vpop.f32.mrb[10].mxu0 }
 0x71b   : > { %v785_v20 = vmax.f32 %v779_v16, 0.0  ;;  %v783_v21 = vpop.f32.mrb[11].mxu0 }
 0x71c   : > { %v786_v22 = vmax.f32 %v781_v18, 0.0 }
 0x71d   : > { %v787_v23 = vpack.c.bf16 %v785_v20, %v785_v20 }
 0x71e   : > { %v788_v24 = vpack.c.bf16 %v786_v22, %v786_v22 }
 0x71f   : > { %793 = vrot.lane.b32.xlu1 %v787_v23, %s1282_s29  ;;  %v803_v28 = vrot.slane %v787_v23, 4 }
 0x720   : > { %790 = vrot.lane.b32.xlu0 %v788_v24, %s1282_s29  ;;  %v804_v29 = vrot.slane %v788_v24, 4  ;;  %s1174_s29 = scalar_lea.vmem %s1605_s7, 128 }
 0x721   : > { %p1175_p0 = scmp.ne.s32.totalorder %s1605_s7, %s1174_s29  ;;  %p1182_p9 = scmp.lt.s32.totalorder %s1180_s23, %s1174_s29 }
 0x723   : > { %p1176_p5 = pnand %p1175_p0, %p1691_p2  ;;  %p1183_p11 = por %p1182_p9, %p1181_p7 }
 0x724   : > { %819 = vperm.xlu0 %1145, %v1042_v25  }
 0x725   : > { %p1177_p6 = pneg %p1176_p5 }
 0x727   : > { %p1184_p13 = pnand %p1183_p11, %p1177_p6 }
 0x791   : > { %v794_v26 = vpop.permute.xlu1 %793 }
 0x792   : > { %v791_v27 = vpop.permute.xlu0 %790 }
 0x793   : > { %v795_v30 = vsel %vm692_vm3, %v794_v26, %v791_v27  ;;  %v799_v31 = vsel %vm692_vm3, %v791_v27, %v794_v26 }
 0x794   : > { %v801_v34 = vsel %vm1564_vm4, %v799_v31, 0  ;;  %v802_v35 = vsel %vm1568_vm5, %v795_v30, 0 }
 0x795   : > { %v811_v38 = vsel %vm321_vm1, %v802_v35, %v804_v29  ;;  %v807_v39 = vsel %vm321_vm1, %v801_v34, %v803_v28 }
 0x796   : > { %825 = vmatprep.subr.bf16.mxu1 %v811_v38 }
 0x797   : > { %826 = vmatpush1.bf16.msra.mxu1 %v807_v39 }
 0x79a   : > { %1043 = vmatmul.mubr.msk.bf16.vlgmr.msra.gmra.mrb[8].mxu1 %vm336_vm2, %v814_v40 }
 0x7a3   : > { %v820_v42 = vpop.permute.xlu0 %819 }
 0x86d   : > { %v859_v41 = vpop.f32.mrb[8].mxu1 }
 0x86e   : > { %v861_v43 = vpop.f32.mrb[9].mxu1 }
 0x86f   : > { %v862_v44 = vadd.f32 %v861_v43, %v820_v42  ;;  %v863_v45 = vpop.f32.mrb[10].mxu1 }
 0x870   : > { %v864_v46 = vpop.f32.mrb[11].mxu1 }
 0x871   : > { %v867_v47 = vmax.f32 %v862_v44, 0.0 }
 0x873   : > { %v869_v48 = vadd.f32 %v867_v47, %v1549_v61 }
 0x875   : > { %v871_v49 = vmax.f32 %v869_v48, 0.0 }
 0x877   : > { %875 = vst [vmem:[%s1689_s21] sm:$0xff] %v871_v49 }
 0x878   : > { %1187 = shalt.err (!%p1184_p13)
}
 0x879   : > { %s1188_s8 = scalar_lea.hbm %s1603_s16, 128  ;;  %s1192_s28 = scalar_lea.hbm %s1663_s3, 512 }
 0x87a   : > { %p1189_p1 = scmp.ne.s32.totalorder %s1603_s16, %s1188_s8  ;;  %p1193_p8 = scmp.lt.u32.totalorder %s1603_s16, %s1663_s3 }
 0x87b   : > { %p1194_p10 = scmp.lt.u32.totalorder %s1192_s28, %s1188_s8  ;;  %p1196_p0 = scmp.lt.u32.totalorder %s1188_s8, %s1603_s16 }
 0x87c   : > { %p1190_p4 = pnand %p1189_p1, %p1691_p2 }
 0x87d   : > { %p1195_p12 = por %p1194_p10, %p1193_p8 }
 0x87e   : > { %p1191_p3 = pneg %p1190_p4 }
 0x87f   : > { %p1197_p5 = por %p1196_p0, %p1195_p12 }
 0x881   : > { %p1198_p6 = pnand %p1197_p5, %p1191_p3 }
 0x883   : > { %1201 = shalt.err (!%p1198_p6)
}
 0x884   : > { %1060 = dma.vmem_to_hbm [thread:$0]  (%p1691_p2), %s1605_s7, 128, %s1603_s16, %s877_s25  }
 0x885 PF: > { %p1072_p7 = scmp.ge.s32.totalorder %s1274_s19, 2  ;;  %s904_s10 = sand.u32 1, %s1246_s12  }
 0x886   : > { %p1692_p9 = scmp.ne.s32.totalorder %s1673_s27, 0  ;;  %s905_s30 = scalar_lea.sflag [#allocation7], %s904_s10 }
 0x888   : > { %p1067_p11 = pnand %p1072_p7, %p1692_p9 }
 0x88a   : > { %1241 = dma.done.wait (!%p1067_p11), %s905_s30, 128  }
 0x88b   : > { %1243 = vsyncadd (!%p1067_p11), %s905_s30, 4294967168  ;;  %s17_s19 = sadd.s32 1, %s1274_s19   ;;  %s1693_s26 = sld [smem:[#allocation14_spill]] }
 0x88c   : > { %p14_p13 = scmp.ge.s32.totalorder %s17_s19, 6   ;;  %s1694_s12 = smov %s1250_s13 }
 0x88d   : > { %s1695_s13 = smov %s1254_s14  ;;  %s1696_s14 = smov %s1383_s5 }
 0x88e   : > { %s1697_s15 = smov %s1266_s17  ;;  %s1698_s16 = smov %s1270_s18 }
 0x88f   : > { %s1699_s17 = smov %s1702_s22  ;;  %16 = sbr.rel (!%p14_p13) target bundleno = 8 (0x8), region = 176 }
 0x891   : > { %s1700_s18 = smov %s1693_s26 }
 0x896   :  { %910 = vsyncpa [#allocation6], 1 }
 0x897   :  { %912 = vsyncpa [#allocation6 + $0x1], 1 }
 0x898   :  { %913 = vsyncpa [#allocation7], 1 }
 0x899   :  { %915 = vsyncpa [#allocation7 + $0x1], 1 }
 0x89a   :  { %916 = vsyncmov [#allocation3] }
 0x89d   :  { %s917_s27 = vpop.sfrf %916 }
 0x89e   :  { %p1049_p2 = scmp.ne.s32.totalorder %s917_s27, 0 }
 0x8a0   :  { %921 = shalt.err (%p1049_p2)  }
 0x8a1   :  { %923 = vsyncmov [#allocation3 + $0x1] }
 0x8a4   :  { %s924_s5 = vpop.sfrf %923 }
 0x8a5   :  { %p1050_p1 = scmp.ne.s32.totalorder %s924_s5, 0 }
 0x8a7   :  { %928 = shalt.err (%p1050_p1)  }

</bundles_post_ra>
